<compile_context>
chip_gen: v5e
topology: v5e:2x2
jax: 0.10.0
libtpu: 0.0.40
codegen_flags: <defaults>
</compile_context>

<pallas_src>
import jax
import jax.numpy as jnp
from jax.experimental import pallas as pl
from jax.experimental.pallas import tpu as pltpu


def _round_up(x, m):
    return (x + m - 1) // m * m


def _critic_kernel(s_ref, a_ref, w1s_ref, w1a_ref, b1_ref, w2_ref, b2_ref,
                   wq_ref, bq_ref, q_ref):
    # s_ref: (TB,S)  a_ref: (TB,A)  w1s: (S,H)  w1a: (A,H)  b1/b2/wq: (1,H)
    # w2: (H,H)  bq: (1,1)  q_ref: (1,1,TB)
    # Fused "concat" matmul: [s | a] @ W1  ==  s @ W1_s + a @ W1_a
    h1 = jnp.dot(s_ref[...], w1s_ref[...], preferred_element_type=jnp.float32)
    h1 = h1 + jnp.dot(a_ref[...], w1a_ref[...], preferred_element_type=jnp.float32)
    h1 = jnp.maximum(h1 + b1_ref[...], 0.0)

    h2 = jnp.dot(h1, w2_ref[...], preferred_element_type=jnp.float32) + b2_ref[...]
    h2 = jnp.maximum(h2, 0.0)

    # Lane-dense final projection: (1,H) @ (H,TB) -> (1,TB) row, stored along lanes.
    q_row = jnp.dot(wq_ref[...], h2.T, preferred_element_type=jnp.float32) + bq_ref[...]
    q_ref[...] = q_row[None, :, :]


def critic_forward(state, action, params, *, tb=None):
    """Pallas implementation of Critic.forward for enc_type='Linear'.

    state:  (B, state_dim) f32
    action: (B, act_dim)   f32
    params: (w1s, w1a, b1, w2, b2, wq, bq), weights in (in, out) layout,
            wq stored as a (1, H) row, bq (1, 1).
    returns (B,) f32
    """
    w1s, w1a, b1, w2, b2, wq, bq = params
    B, S = state.shape
    A = action.shape[1]
    H = w2.shape[0]

    # Batch tile: multiple of 8 (sublane); 256 for real batches (fits default
    # scoped VMEM on v5e/v6e/v7x for the weight sizes this critic uses).
    if tb is None:
        tb = 256 if B >= 256 else _round_up(max(B, 1), 8)
    b_pad = _round_up(B, tb)
    if b_pad != B:
        state = jnp.pad(state, ((0, b_pad - B), (0, 0)))
        action = jnp.pad(action, ((0, b_pad - B), (0, 0)))
    n_tiles = b_pad // tb

    flops = 2 * b_pad * H * (S + A + H + 1)
    bytes_accessed = 4 * (b_pad * (S + A + 1)          # activations + output
                          + (S + A) * H + (H + 1) * H  # weights
                          + 3 * H + 1)                 # biases + wq row

    q = pl.pallas_call(
        _critic_kernel,
        out_shape=jax.ShapeDtypeStruct((n_tiles, 1, tb), jnp.float32),
        grid=(n_tiles,),
        in_specs=[
            pl.BlockSpec((tb, S), lambda i: (i, 0)),   # state tile
            pl.BlockSpec((tb, A), lambda i: (i, 0)),   # action tile
            pl.BlockSpec((S, H), lambda i: (0, 0)),    # W1_s (resident)
            pl.BlockSpec((A, H), lambda i: (0, 0)),    # W1_a (resident)
            pl.BlockSpec((1, H), lambda i: (0, 0)),    # b1
            pl.BlockSpec((H, H), lambda i: (0, 0)),    # W2   (resident)
            pl.BlockSpec((1, H), lambda i: (0, 0)),    # b2
            pl.BlockSpec((1, H), lambda i: (0, 0)),    # wq row
            pl.BlockSpec((1, 1), lambda i: (0, 0)),    # bq
        ],
        out_specs=pl.BlockSpec((1, 1, tb), lambda i: (i, 0, 0)),
        compiler_params=pltpu.CompilerParams(
            dimension_semantics=("parallel",)),
        cost_estimate=pl.CostEstimate(
            flops=flops, transcendentals=0, bytes_accessed=bytes_accessed),
    )(state, action, w1s, w1a, b1, w2, b2, wq, bq)

    return q.reshape(b_pad)[:B]


def init_critic_params(key, state_dim, act_dim, hid_size):
    """Deterministic synthetic params; weights stored as (in, out) = W^T.

    Note: for real model sizes, prefer hid_size a multiple of 128 so MXU/vreg
    lanes are fully used; the kernel is correct for any size.
    """
    ks = jax.random.split(key, 6)
    in1 = state_dim + act_dim

    def lin(kw, kb, fan_in, fan_out):
        bound = 1.0 / jnp.sqrt(fan_in)
        w = jax.random.uniform(kw, (fan_in, fan_out), jnp.float32, -bound, bound)
        b = jax.random.uniform(kb, (1, fan_out), jnp.float32, -bound, bound)
        return w, b

    w1, b1 = lin(ks[0], ks[1], in1, hid_size)
    w1s, w1a = w1[:state_dim], w1[state_dim:]          # split for the fused-concat matmul
    w2, b2 = lin(ks[2], ks[3], hid_size, hid_size)
    wq_col, bq = lin(ks[4], ks[5], hid_size, 1)        # (H,1), (1,1)
    wq = wq_col.T                                      # (1,H) row layout for the kernel
    return (w1s, w1a, b1, w2, b2, wq, bq)


def _reference(state, action, params):
    w1s, w1a, b1, w2, b2, wq, bq = params
    w1 = jnp.concatenate([w1s, w1a], axis=0)
    x = jnp.concatenate([state, action], axis=-1)
    h1 = jnp.maximum(x @ w1 + b1, 0.0)
    h2 = jnp.maximum(h1 @ w2 + b2, 0.0)
    return jnp.squeeze(h2 @ wq.T + bq, axis=-1)


if __name__ == "__main__":
    B, STATE_DIM, ACT_DIM, HID = 2, 16, 8, 32

    key = jax.random.PRNGKey(0)
    k_state, k_action, k_params = jax.random.split(key, 3)

    state = jax.random.normal(k_state, (B, STATE_DIM), jnp.float32)
    action = jax.random.normal(k_action, (B, ACT_DIM), jnp.float32)
    params = init_critic_params(k_params, STATE_DIM, ACT_DIM, HID)

    q = critic_forward(state, action, params)
    q = jax.block_until_ready(q)

    q_ref = _reference(state, action, params)
    assert q.shape == (B,), q.shape
    assert jnp.allclose(q, q_ref, atol=1e-4, rtol=1e-4), (q, q_ref)

    print("KERNEL_OK")
</pallas_src>

<mosaic_0001>
module attributes {stable_mosaic.version = 11 : i64} {
  func.func @_critic_kernel(%arg0: i32, %arg1: memref<8x16xf32, #tpu.memory_space<vmem>>, %arg2: memref<8x8xf32, #tpu.memory_space<vmem>>, %arg3: memref<16x32xf32, #tpu.memory_space<vmem>>, %arg4: memref<8x32xf32, #tpu.memory_space<vmem>>, %arg5: memref<1x32xf32, #tpu.memory_space<vmem>>, %arg6: memref<32x32xf32, #tpu.memory_space<vmem>>, %arg7: memref<1x32xf32, #tpu.memory_space<vmem>>, %arg8: memref<1x32xf32, #tpu.memory_space<vmem>>, %arg9: memref<1x1xf32, #tpu.memory_space<vmem>>, %arg10: memref<1x1x8xf32, #tpu.memory_space<vmem>>) attributes {dimension_semantics = [#tpu.dimension_semantics<parallel>], iteration_bounds = array<i64: 1>, scalar_prefetch = 0 : i64, scratch_operands = 0 : i64, tpu.core_type = #tpu.core_type<tc>, window_params = [{transform_indices = @transform_0, window_bounds = array<i64: 8, 16>}, {transform_indices = @transform_1, window_bounds = array<i64: 8, 8>}, {pipeline_mode = #tpu.pipeline_mode<synchronous>, transform_indices = @transform_2, window_bounds = array<i64: 16, 32>}, {pipeline_mode = #tpu.pipeline_mode<synchronous>, transform_indices = @transform_3, window_bounds = array<i64: 8, 32>}, {pipeline_mode = #tpu.pipeline_mode<synchronous>, transform_indices = @transform_4, window_bounds = array<i64: 1, 32>}, {pipeline_mode = #tpu.pipeline_mode<synchronous>, transform_indices = @transform_5, window_bounds = array<i64: 32, 32>}, {pipeline_mode = #tpu.pipeline_mode<synchronous>, transform_indices = @transform_6, window_bounds = array<i64: 1, 32>}, {pipeline_mode = #tpu.pipeline_mode<synchronous>, transform_indices = @transform_7, window_bounds = array<i64: 1, 32>}, {pipeline_mode = #tpu.pipeline_mode<synchronous>, transform_indices = @transform_8, window_bounds = array<i64: 1, 1>}, {transform_indices = @transform_9, window_bounds = array<i64: 1, 1, 8>}]} {
    %c0 = arith.constant 0 : index
    %c0_0 = arith.constant 0 : index
    %0 = vector.load %arg1[%c0, %c0_0] : memref<8x16xf32, #tpu.memory_space<vmem>>, vector<8x16xf32>
    %c0_1 = arith.constant 0 : index
    %c0_2 = arith.constant 0 : index
    %1 = vector.load %arg3[%c0_1, %c0_2] : memref<16x32xf32, #tpu.memory_space<vmem>>, vector<16x32xf32>
    %cst = arith.constant dense<0.000000e+00> : vector<8x32xf32>
    %2 = tpu.matmul %0, %1, %cst {dimension_numbers = #tpu.dot_dimension_numbers<[1], [0], [0], [1], [0, 0, 1, 1], [], []>} : vector<8x16xf32>, vector<16x32xf32>, vector<8x32xf32> -> vector<8x32xf32>
    %c0_3 = arith.constant 0 : index
    %c0_4 = arith.constant 0 : index
    %3 = vector.load %arg2[%c0_3, %c0_4] : memref<8x8xf32, #tpu.memory_space<vmem>>, vector<8x8xf32>
    %c0_5 = arith.constant 0 : index
    %c0_6 = arith.constant 0 : index
    %4 = vector.load %arg4[%c0_5, %c0_6] : memref<8x32xf32, #tpu.memory_space<vmem>>, vector<8x32xf32>
    %cst_7 = arith.constant dense<0.000000e+00> : vector<8x32xf32>
    %5 = tpu.matmul %3, %4, %cst_7 {dimension_numbers = #tpu.dot_dimension_numbers<[1], [0], [0], [1], [0, 0, 1, 1], [], []>} : vector<8x8xf32>, vector<8x32xf32>, vector<8x32xf32> -> vector<8x32xf32>
    %6 = arith.addf %2, %5 : vector<8x32xf32>
    %c0_8 = arith.constant 0 : index
    %c0_9 = arith.constant 0 : index
    %7 = vector.load %arg5[%c0_8, %c0_9] : memref<1x32xf32, #tpu.memory_space<vmem>>, vector<1x32xf32>
    %8 = vector.broadcast %7 : vector<1x32xf32> to vector<8x32xf32>
    %9 = arith.addf %6, %8 : vector<8x32xf32>
    %cst_10 = arith.constant 0.000000e+00 : f32
    %10 = vector.broadcast %cst_10 : f32 to vector<8x32xf32>
    %11 = arith.maximumf %9, %10 : vector<8x32xf32>
    %c0_11 = arith.constant 0 : index
    %c0_12 = arith.constant 0 : index
    %12 = vector.load %arg6[%c0_11, %c0_12] : memref<32x32xf32, #tpu.memory_space<vmem>>, vector<32x32xf32>
    %cst_13 = arith.constant dense<0.000000e+00> : vector<8x32xf32>
    %13 = tpu.matmul %11, %12, %cst_13 {dimension_numbers = #tpu.dot_dimension_numbers<[1], [0], [0], [1], [0, 0, 1, 1], [], []>} : vector<8x32xf32>, vector<32x32xf32>, vector<8x32xf32> -> vector<8x32xf32>
    %c0_14 = arith.constant 0 : index
    %c0_15 = arith.constant 0 : index
    %14 = vector.load %arg7[%c0_14, %c0_15] : memref<1x32xf32, #tpu.memory_space<vmem>>, vector<1x32xf32>
    %15 = vector.broadcast %14 : vector<1x32xf32> to vector<8x32xf32>
    %16 = arith.addf %13, %15 : vector<8x32xf32>
    %cst_16 = arith.constant 0.000000e+00 : f32
    %17 = vector.broadcast %cst_16 : f32 to vector<8x32xf32>
    %18 = arith.maximumf %16, %17 : vector<8x32xf32>
    %c0_17 = arith.constant 0 : index
    %c0_18 = arith.constant 0 : index
    %19 = vector.load %arg8[%c0_17, %c0_18] : memref<1x32xf32, #tpu.memory_space<vmem>>, vector<1x32xf32>
    %20 = tpu.transpose %18, [1, 0] : vector<8x32xf32> -> vector<32x8xf32>
    %cst_19 = arith.constant dense<0.000000e+00> : vector<1x8xf32>
    %21 = tpu.matmul %19, %20, %cst_19 {dimension_numbers = #tpu.dot_dimension_numbers<[1], [0], [0], [1], [0, 0, 1, 1], [], []>} : vector<1x32xf32>, vector<32x8xf32>, vector<1x8xf32> -> vector<1x8xf32>
    %c0_20 = arith.constant 0 : index
    %c0_21 = arith.constant 0 : index
    %22 = vector.load %arg9[%c0_20, %c0_21] : memref<1x1xf32, #tpu.memory_space<vmem>>, vector<1x1xf32>
    %23 = vector.broadcast %22 : vector<1x1xf32> to vector<1x8xf32>
    %24 = arith.addf %21, %23 : vector<1x8xf32>
    %25 = vector.shape_cast %24 : vector<1x8xf32> to vector<1x1x8xf32>
    %c0_22 = arith.constant 0 : index
    %c0_23 = arith.constant 0 : index
    %c0_24 = arith.constant 0 : index
    %26 = vector.load %arg10[%c0_22, %c0_23, %c0_24] : memref<1x1x8xf32, #tpu.memory_space<vmem>>, vector<1x1x8xf32>
    tpu.vector_store %arg10[%c0_22, %c0_23, %c0_24], %25 {strides = array<i32>} : memref<1x1x8xf32, #tpu.memory_space<vmem>>, vector<1x1x8xf32>,
    return
  }
  func.func @transform_0(%arg0: i32) -> (i32, i32) {
    %c0_i32 = arith.constant 0 : i32
    %c0_i32_0 = arith.constant 0 : i32
    return %arg0, %c0_i32 : i32, i32
  }
  func.func @transform_1(%arg0: i32) -> (i32, i32) {
    %c0_i32 = arith.constant 0 : i32
    %c0_i32_0 = arith.constant 0 : i32
    return %arg0, %c0_i32 : i32, i32
  }
  func.func @transform_2(%arg0: i32) -> (i32, i32) {
    %c0_i32 = arith.constant 0 : i32
    %c0_i32_0 = arith.constant 0 : i32
    %c0_i32_1 = arith.constant 0 : i32
    return %c0_i32, %c0_i32_0 : i32, i32
  }
  func.func @transform_3(%arg0: i32) -> (i32, i32) {
    %c0_i32 = arith.constant 0 : i32
    %c0_i32_0 = arith.constant 0 : i32
    %c0_i32_1 = arith.constant 0 : i32
    return %c0_i32, %c0_i32_0 : i32, i32
  }
  func.func @transform_4(%arg0: i32) -> (i32, i32) {
    %c0_i32 = arith.constant 0 : i32
    %c0_i32_0 = arith.constant 0 : i32
    %c0_i32_1 = arith.constant 0 : i32
    return %c0_i32, %c0_i32_0 : i32, i32
  }
  func.func @transform_5(%arg0: i32) -> (i32, i32) {
    %c0_i32 = arith.constant 0 : i32
    %c0_i32_0 = arith.constant 0 : i32
    %c0_i32_1 = arith.constant 0 : i32
    return %c0_i32, %c0_i32_0 : i32, i32
  }
  func.func @transform_6(%arg0: i32) -> (i32, i32) {
    %c0_i32 = arith.constant 0 : i32
    %c0_i32_0 = arith.constant 0 : i32
    %c0_i32_1 = arith.constant 0 : i32
    return %c0_i32, %c0_i32_0 : i32, i32
  }
  func.func @transform_7(%arg0: i32) -> (i32, i32) {
    %c0_i32 = arith.constant 0 : i32
    %c0_i32_0 = arith.constant 0 : i32
    %c0_i32_1 = arith.constant 0 : i32
    return %c0_i32, %c0_i32_0 : i32, i32
  }
  func.func @transform_8(%arg0: i32) -> (i32, i32) {
    %c0_i32 = arith.constant 0 : i32
    %c0_i32_0 = arith.constant 0 : i32
    %c0_i32_1 = arith.constant 0 : i32
    return %c0_i32, %c0_i32_0 : i32, i32
  }
  func.func @transform_9(%arg0: i32) -> (i32, i32, i32) {
    %c0_i32 = arith.constant 0 : i32
    %c0_i32_0 = arith.constant 0 : i32
    %c0_i32_1 = arith.constant 0 : i32
    return %arg0, %c0_i32, %c0_i32_0 : i32, i32, i32
  }
}

</mosaic_0001>

<bundles_post_ra>
// kernel: tpu_custom_call.1
= control target key start
LH: loop header
LB: loop body
LE: loop exit
PB: predicated region body
PF: predicated region fallthrough
CT: control target
= control target key end

     0   :  { %s512_s0 = inlined_call_operand.hbm [shape: f32[8,16], index: 0, kind: input, shape index: {}]   ;;  %s513_s1 = inlined_call_operand.hbm [shape: f32[8,8], index: 1, kind: input, shape index: {}]   ;;  %s514_s2 = inlined_call_operand.hbm [shape: f32[16,32], index: 2, kind: input, shape index: {}]   ;;  %s515_s3 = inlined_call_operand.hbm [shape: f32[8,32], index: 3, kind: input, shape index: {}]   ;;  %s516_s4 = inlined_call_operand.vmem [shape: f32[1,32], index: 4, kind: input, shape index: {}]   ;;  %s517_s5 = inlined_call_operand.hbm [shape: f32[32,32], index: 5, kind: input, shape index: {}]   ;;  %s518_s6 = inlined_call_operand.vmem [shape: f32[1,32], index: 6, kind: input, shape index: {}]   ;;  %s519_s7 = inlined_call_operand.vmem [shape: f32[1,32], index: 7, kind: input, shape index: {}]   ;;  %s520_s8 = inlined_call_operand.<no memory space> [shape: f32[1,1], index: 8, kind: input, shape index: {}]   ;;  %s521_s9 = inlined_call_operand.hbm [shape: f32[1,1,8], index: 9, kind: output, shape index: {}]  }
   0x1   :  { %v14_v0 = vstv %s520_s8 }
   0x2   :  { %15 = vst [vmem:[#allocation2] sm:$0x1] %v14_v0 }
   0x3   :  { %16 = vsyncpa [#allocation4], 0 }
   0x4   :  { %17 = vsyncpa [#allocation7], 0 }
   0x5   :  { %18 = vsyncpa [#allocation10], 0  ;;  %s36_s13 = sshll.u32 %s513_s1, 4  ;;  %s37_s13 = int_to_ptr.hbm [resolvable:$true] %s36_s13 }
   0x6   :  { %19 = vsyncpa [#allocation5], 0  ;;  %s423_s14 = smov [#allocation6]   ;;  %s60_s18 = sshll.u32 %s515_s3, 4  ;;  %s61_s18 = int_to_ptr.hbm [resolvable:$true] %s60_s18 }
   0x7   :  { %s38_s15 = sshll.u32 %s423_s14, 4  ;;  %s424_s8 = smov [#allocation9]   ;;  %s39_s15 = int_to_ptr.vmem [resolvable:$true] %s38_s15 }
   0x8   :  { %41 = dma.hbm_to_vmem [thread:$0]  %s37_s13, 128, %s39_s15, [#allocation7]  }
   0x9   :  { %s62_s19 = sshll.u32 %s424_s8, 4  ;;  %s25_s22 = sshll.u32 %s512_s0, 4  ;;  %s63_s19 = int_to_ptr.vmem [resolvable:$true] %s62_s19  ;;  %s26_s22 = int_to_ptr.hbm [resolvable:$true] %s25_s22 }
   0xa   :  { %65 = dma.hbm_to_vmem [thread:$0]  %s61_s18, 128, %s63_s19, [#allocation10]  }
   0xb   :  { %s46_s24 = sshll.u32 %s514_s2, 4  ;;  %s425_s25 = smov [#allocation3]   ;;  %s47_s24 = int_to_ptr.hbm [resolvable:$true] %s46_s24 }
   0xc   :  { %s27_s26 = sshll.u32 %s425_s25, 4  ;;  %s426_s3 = smov [#allocation8]   ;;  %s28_s26 = int_to_ptr.vmem [resolvable:$true] %s27_s26 }
   0xd   :  { %30 = dma.hbm_to_vmem [thread:$0]  %s26_s22, 128, %s28_s26, [#allocation4]  }
   0xe   :  { %s48_s27 = sshll.u32 %s426_s3, 4  ;;  %s427_s28 = smov 128   ;;  %s49_s27 = int_to_ptr.vmem [resolvable:$true] %s48_s27 }
   0xf   :  { %s428_s29 = smov 8   ;;  %s72_s10 = sshll.u32 %s517_s5, 4  ;;  %s73_s10 = int_to_ptr.hbm [resolvable:$true] %s72_s10 }
  0x10   :  { %54 = dma.hbm_to_vmem [thread:$0]  %s47_s24, 256, %s49_s27, [#allocation7], %s427_s28, %s427_s28, %s428_s29  }
  0x11   :  { %s429_s11 = smov [#allocation11]  }
  0x12   :  { %s74_s12 = sshll.u32 %s429_s11, 4  ;;  %s75_s12 = int_to_ptr.vmem [resolvable:$true] %s74_s12 }
  0x13   :  { %80 = dma.hbm_to_vmem [thread:$0]  %s73_s10, 512, %s75_s12, [#allocation10], %s427_s28, %s427_s28, %s428_s29  }
  0x14   :  { %415 = dma.done.wait [#allocation4], 128  }
  0x15   :  { %416 = vsyncadd [#allocation4], 4294967168 }
  0x16   :  { %417 = dma.done.wait [#allocation7], 384  }
  0x17   :  { %418 = vsyncadd [#allocation7], 4294966912 }
  0x18   :  { %419 = dma.done.wait [#allocation10], 640  }
  0x19   :  { %420 = vsyncadd [#allocation10], 4294966656  ;;  %vm112_vm0 = vcmask 64512   ;;  %v109_v1 = vld [vmem:[#allocation8 + $0x8] sm:$0xff]  ;;  %v111_v2 = vld [vmem:[#allocation9] sm:$0xff]  ;;  %vm136_vm1 = vcmask 130048  }
  0x1a   :  { %v108_v3 = vld [vmem:[#allocation8] sm:$0xff]  ;;  %154 = vmatpush.msra.mxu1 %v109_v1  ;;  %131 = vmatpush.msra.mxu0 %v111_v2  ;;  %v110_v4 = vld [vmem:[#allocation6] sm:$0xff]  ;;  %v107_v5 = vld [vmem:[#allocation3] sm:$0xff]  ;;  %vm174_vm2 = vcmask 261120   ;;  %v430_v17 = vmov 0   ;;  %s431_s16 = smov [#allocation12]  }
  0x1b   :  { %254 = vmatmul.msk.f32.vlgmr.msra.gmra.mxu0 %vm112_vm0, %v110_v4  ;;  %v169_v6 = vld [vmem:[#allocation11 + $0x18] sm:$0xff]  ;;  %v168_v7 = vld [vmem:[#allocation11 + $0x10] sm:$0xff]  ;;  %v167_v8 = vld [vmem:[#allocation11 + $0x8] sm:$0xff]  ;;  %268 = vset.pattern.permute.xlu0 %v430_v17  ;;  %s240_s17 = sshll.u32 %s431_s16, 4  ;;  %s242_s19 = sshll.u32 %s521_s9, 4  ;;  %vm233_vm3 = vcmask 57344   ;;  %s241_s17 = int_to_ptr.vmem [resolvable:$true] %s240_s17  ;;  %s243_s19 = int_to_ptr.hbm [resolvable:$true] %s242_s19 }
  0x1c   :  { %155 = vmatpush.msra.mxu1 %v108_v3  ;;  %190 = vmatpush.msra.mxu2 %v169_v6  ;;  %v166_v9 = vld [vmem:[#allocation11] sm:$0xff]  ;;  %v269_v11 = vld [vmem:[%s516_s4] ss:$0 sm:$0xff] }
  0x1d   :  { %255 = vmatmul.msk.f32.vlgmr.msra.gmra.mxu1 %vm136_vm1, %v107_v5  ;;  %v200_v16 = vld [vmem:[#allocation2] sm:$0x1] }
  0x1e   :  { %191 = vmatpush.msra.mxu2 %v168_v7  ;;  %203 = vperm.xlu0 %268, %v200_v16   ;;  %v270_v18 = vld [vmem:[%s518_s6] ss:$0 sm:$0xff] }
  0x1f   :  { %v199_v22 = vld [vmem:[%s519_s7] sm:$0x1] }
  0x20   :  { %192 = vmatpush.msra.mxu2 %v167_v8 }
  0x22   :  { %193 = vmatpush.msra.mxu2 %v166_v9 }
  0x90   :  { %v204_v23 = vpop.permute.xlu0 %203 }
  0x91   :  { %v206_v24 = vperm.slane %v204_v23, 0 }
  0x98   :  { %v133_v10 = vpop.f32.mrf.mxu0 }
  0x9a   :  { %v157_v12 = vpop.f32.mrf.mxu1 }
  0x9b   :  { %v158_v13 = vadd.f32 %v157_v12, %v133_v10 }
  0x9d   :  { %v164_v14 = vadd.f32 %v269_v11, %v158_v13 }
  0x9f   :  { %v165_v15 = vmax.f32 %v164_v14, 0.0 }
  0xa1   :  { %256 = vmatmul.msk.f32.vlgmr.msra.gmra.mxu2 %vm174_vm2, %v165_v15 }
 0x124   :  { %v195_v19 = vpop.f32.mrf.mxu2 }
 0x125   :  { %v196_v20 = vadd.f32 %v270_v18, %v195_v19 }
 0x127   :  { %v198_v21 = vmax.f32 %v196_v20, 0.0 }
 0x129   :  { %257 = vmatpush.xpose.msk.msra.mxu3 %vm174_vm2, %v198_v21 }
 0x12c   :  { %258 = vmatmul.msk.f32.vlgmr.msra.gmra.mxu3 %vm174_vm2, %v199_v22 }
 0x1af   :  { %v230_v25 = vpop.f32.mrf.mxu3 }
 0x1b0   :  { %v231_v26 = vadd.f32 %v230_v25, %v206_v24 }
 0x1b2   :  { %234 = vst.msk [vmem:[#allocation12] sm:$0x1] %vm233_vm3, %v231_v26 }
 0x1b3   :  { %245 = dma.vmem_to_hbm [thread:$0]  %s241_s17, 16, %s243_s19, [#allocation5]  }
 0x1b4   :  { %421 = dma.done.wait [#allocation5], 16  }
 0x1b5   :  { %422 = vsyncadd [#allocation5], 4294967280 }
 0x1b6   :  { %250 = vsyncpa [#allocation4], 1 }
 0x1b7   :  { %251 = vsyncpa [#allocation7], 1 }
 0x1b8   :  { %252 = vsyncpa [#allocation10], 1 }
 0x1b9   :  { %253 = vsyncpa [#allocation5], 1 }

</bundles_post_ra>
